<compile_context>
chip_gen: v7x
topology: tpu7x:2x2x1
jax: 0.10.0
libtpu: 0.0.40
codegen_flags: <defaults>
</compile_context>

<pallas_src>
import functools

import jax
import jax.numpy as jnp
from jax.experimental import pallas as pl
from jax.experimental.pallas import tpu as pltpu


def _round_up(x, m):
    return ((x + m - 1) // m) * m


def _tile(dim, cap):
    # Block size along a sublane/lane-facing axis: the full dim when small
    # (block == full array dim is always a legal BlockSpec), else the
    # hardware-friendly cap (multiple of 8 / 128).
    return cap if dim >= cap else dim


def _bf16_transcendentals_ok():
    # bf16 VPU/EUP (add/mul/tanh) exists on v6e / v7x; v5e stays f32.
    # NOTE: trace-time device query — under AOT / mock compilation this may
    # pick the wrong dtype; it only changes precision, never the math.
    try:
        kind = jax.devices()[0].device_kind.lower()
    except Exception:
        return False
    return any(tag in kind for tag in ("v6", "v7", "7x"))


# ----------------------------------------------------------------------------
# sL = source @ Ws : one MXU matmul per (batch, row-tile), bf16 output.
# ----------------------------------------------------------------------------
def copynet_source_proj_kernel(src_ref, ws_ref, sl_ref):
    sl_ref[0] = jnp.dot(
        src_ref[0], ws_ref[...],
        preferred_element_type=jnp.float32).astype(sl_ref.dtype)


# ----------------------------------------------------------------------------
# tL = target @ Wt and prob = relu(target @ Wp + bp), fused in one matmul
# against the concatenated [Wt | Wp_padded] weight.
# ----------------------------------------------------------------------------
def copynet_target_proj_kernel(tgt_ref, wtp_ref, bp_ref, tl_ref, prob_ref):
    acc = jnp.dot(tgt_ref[0], wtp_ref[...],
                  preferred_element_type=jnp.float32)        # (tR, Epad+128)
    e = tl_ref.shape[-1]
    tl_ref[0] = acc[:, :e].astype(tl_ref.dtype)
    prob_ref[0] = jnp.maximum(acc[:, e:] + bp_ref[...], 0.0).astype(prob_ref.dtype)


# ----------------------------------------------------------------------------
# genP kernel: one (batch, S-tile, T-tile) block per grid step.
# Inner pl.loop processes one target row at a time so the tanh panel
# (1, tS, Epad) stays register-resident; reduction over E is fused per panel.
# ----------------------------------------------------------------------------
def copynet_genp_kernel(sl_ref, tl_ref, wr_ref, br_ref, genp_ref, *, tanh_dtype):
    # sl_ref: (1, tS, Epad) bf16   tl_ref: (1, tT, Epad) bf16
    # wr_ref: (1, Epad) f32        br_ref: (1,) f32 in SMEM
    # genp_ref: (1, tT, tS) f32
    sl3 = sl_ref[0].astype(tanh_dtype)[None, :, :]          # (1, tS, Epad)
    wr3 = wr_ref[...].astype(tanh_dtype)[:, None, :]        # (1, 1, Epad)
    br = br_ref[0]                                          # scalar bias
    t_rows = tl_ref.shape[1]

    @pl.loop(0, t_rows)
    def _(t):
        tl_row = tl_ref[0, pl.ds(t, 1), :].astype(tanh_dtype)   # (1, Epad)
        x = tl_row[:, None, :] + sl3                             # (1, tS, Epad)
        h = jnp.tanh(x)
        # bf16 multiply (v6e/v7x), f32 accumulate only.
        r = jnp.sum((h * wr3).astype(jnp.float32), axis=-1)      # (1, tS)
        genp_ref[0, pl.ds(t, 1), :] = (r + br).astype(genp_ref.dtype)


def copynet_forward(source, target, ws, wt, wr, br, wp, bp):
    B, S, E = source.shape
    _, T, _ = target.shape

    epad = _round_up(E, 128)
    tanh_dtype = jnp.bfloat16 if _bf16_transcendentals_ok() else jnp.float32

    # Projection row tiles (MXU M dim) and genP tiles.
    tRs = _tile(S, 256)
    tRt = _tile(T, 256)
    tS = _tile(S, 128)
    tT = _tile(T, 128)

    # Only the feature axis is zero-padded; padded weight rows/cols are zero
    # so padded features contribute exactly zero.  S / T use pl.cdiv grids
    # with masked edge blocks (no padding, no output slice).
    src_p = jnp.pad(source, ((0, 0), (0, 0), (0, epad - E))).astype(jnp.bfloat16)
    tgt_p = jnp.pad(target, ((0, 0), (0, 0), (0, epad - E))).astype(jnp.bfloat16)
    ws_p = jnp.pad(ws, ((0, epad - E), (0, epad - E))).astype(jnp.bfloat16)

    # Fused [Wt | Wp] weight; prob columns padded to one 128-lane group.
    wtp = jnp.zeros((epad, epad + 128), jnp.float32)
    wtp = wtp.at[:E, :E].set(wt).at[:E, epad:epad + 2].set(wp)
    wtp = wtp.astype(jnp.bfloat16)
    bp_pad = jnp.zeros((1, 128), jnp.float32).at[0, :2].set(bp.reshape(-1))

    wr_p = jnp.pad(wr.reshape(1, E), ((0, 0), (0, epad - E)))    # (1, epad) f32
    br_s = br.reshape(1).astype(jnp.float32)

    # ---- sL = source @ Ws (computed once, bf16 out) ------------------------
    sl = pl.pallas_call(
        copynet_source_proj_kernel,
        out_shape=jax.ShapeDtypeStruct((B, S, epad), jnp.bfloat16),
        grid_spec=pltpu.PrefetchScalarGridSpec(
            num_scalar_prefetch=0,
            grid=(B, pl.cdiv(S, tRs)),
            in_specs=[
                pl.BlockSpec((1, tRs, epad), lambda b, r: (b, r, 0)),
                pl.BlockSpec((epad, epad), lambda b, r: (0, 0)),
            ],
            out_specs=pl.BlockSpec((1, tRs, epad), lambda b, r: (b, r, 0)),
        ),
        compiler_params=pltpu.CompilerParams(
            dimension_semantics=("parallel", "parallel")),
    )(src_p, ws_p)

    # ---- tL = target @ Wt, prob = relu(target @ Wp + bp), fused ------------
    tl, prob_pad = pl.pallas_call(
        copynet_target_proj_kernel,
        out_shape=(jax.ShapeDtypeStruct((B, T, epad), jnp.bfloat16),
                   jax.ShapeDtypeStruct((B, T, 128), jnp.float32)),
        grid_spec=pltpu.PrefetchScalarGridSpec(
            num_scalar_prefetch=0,
            grid=(B, pl.cdiv(T, tRt)),
            in_specs=[
                pl.BlockSpec((1, tRt, epad), lambda b, r: (b, r, 0)),
                pl.BlockSpec((epad, epad + 128), lambda b, r: (0, 0)),
                pl.BlockSpec((1, 128), lambda b, r: (0, 0)),
            ],
            out_specs=[
                pl.BlockSpec((1, tRt, epad), lambda b, r: (b, r, 0)),
                pl.BlockSpec((1, tRt, 128), lambda b, r: (b, r, 0)),
            ],
        ),
        compiler_params=pltpu.CompilerParams(
            dimension_semantics=("parallel", "parallel")),
    )(tgt_p, wtp, bp_pad)
    prob = prob_pad[..., :2]

    # ---- genP: pure VPU/EUP work on the hoisted bf16 projections -----------
    genp = pl.pallas_call(
        functools.partial(copynet_genp_kernel, tanh_dtype=tanh_dtype),
        out_shape=jax.ShapeDtypeStruct((B, T, S), jnp.float32),
        grid_spec=pltpu.PrefetchScalarGridSpec(
            num_scalar_prefetch=0,
            # t innermost: the sL tile index is constant across it (no re-DMA).
            grid=(B, pl.cdiv(S, tS), pl.cdiv(T, tT)),
            in_specs=[
                pl.BlockSpec((1, tS, epad), lambda b, s, t: (b, s, 0)),   # sL
                pl.BlockSpec((1, tT, epad), lambda b, s, t: (b, t, 0)),   # tL
                pl.BlockSpec((1, epad), lambda b, s, t: (0, 0)),          # w_res^T
                pl.BlockSpec(memory_space=pltpu.MemorySpace.SMEM),        # b_res
            ],
            out_specs=pl.BlockSpec((1, tT, tS), lambda b, s, t: (b, t, s)),
        ),
        compiler_params=pltpu.CompilerParams(
            dimension_semantics=("parallel", "parallel", "parallel")),
    )(sl, tl, wr_p, br_s)

    return genp, prob


def reference_forward(source, target, ws, wt, wr, br, wp, bp):
    sL = source @ ws                                        # (B, S, E)
    tL = target @ wt                                        # (B, T, E)
    h = jnp.tanh(sL[:, None, :, :] + tL[:, :, None, :])     # (B, T, S, E)
    genp = jnp.squeeze(h @ wr, -1) + br[0, 0]               # (B, T, S)
    prob = jax.nn.relu(target @ wp + bp[0])                 # (B, T, 2)
    return genp, prob


if __name__ == "__main__":
    B, S, T, E = 2, 8, 8, 32   # batch, source len, target len, ast_feature_dim

    key = jax.random.PRNGKey(0)
    k_src, k_tgt = jax.random.split(key)
    source = jax.random.normal(k_src, (B, S, E), dtype=jnp.float32)
    target = jax.random.normal(k_tgt, (B, T, E), dtype=jnp.float32)

    # Deterministic parameter init (synthetic; shapes from CopyNet.__init__).
    wkey = jax.random.PRNGKey(42)
    kws, kwt, kwr, kbr, kwp, kbp = jax.random.split(wkey, 6)
    scale = 1.0 / jnp.sqrt(E)
    ws = jax.random.uniform(kws, (E, E), jnp.float32, -scale, scale)  # LinearSource.weight^T
    wt = jax.random.uniform(kwt, (E, E), jnp.float32, -scale, scale)  # LinearTarget.weight^T
    wr = jax.random.uniform(kwr, (E, 1), jnp.float32, -scale, scale)  # LinearRes.weight^T
    br = jax.random.uniform(kbr, (1, 1), jnp.float32, -scale, scale)  # LinearRes.bias
    wp = jax.random.uniform(kwp, (E, 2), jnp.float32, -scale, scale)  # LinearProb.weight^T
    bp = jax.random.uniform(kbp, (1, 2), jnp.float32, -scale, scale)  # LinearProb.bias

    genp, prob = copynet_forward(source, target, ws, wt, wr, br, wp, bp)
    jax.block_until_ready((genp, prob))

    genp_ref, prob_ref = reference_forward(source, target, ws, wt, wr, br, wp, bp)
    assert genp.shape == (B, T, S) and prob.shape == (B, T, 2)
    # bf16 MXU operands / bf16 projection storage (and bf16 tanh on v6e/v7x)
    # -> loosened tolerance; f32 accumulation keeps errors inside this bound.
    assert jnp.allclose(genp, genp_ref, atol=4e-2, rtol=4e-2)
    assert jnp.allclose(prob, prob_ref, atol=4e-2, rtol=4e-2)

    print("KERNEL_OK")
</pallas_src>

<mosaic_0001>
module attributes {stable_mosaic.version = 11 : i64} {
  func.func @copynet_source_proj_kernel(%arg0: i32, %arg1: i32, %arg2: memref<1x8x128xbf16, #tpu.memory_space<vmem>>, %arg3: memref<128x128xbf16, #tpu.memory_space<vmem>>, %arg4: memref<1x8x128xbf16, #tpu.memory_space<vmem>>) attributes {dimension_semantics = [#tpu.dimension_semantics<parallel>, #tpu.dimension_semantics<parallel>], iteration_bounds = array<i64: 2, 1>, scalar_prefetch = 0 : i64, scratch_operands = 0 : i64, tpu.core_type = #tpu.core_type<tc>, window_params = [{transform_indices = @transform_0, window_bounds = array<i64: 1, 8, 128>}, {pipeline_mode = #tpu.pipeline_mode<synchronous>, transform_indices = @transform_1, window_bounds = array<i64: 128, 128>}, {transform_indices = @transform_2, window_bounds = array<i64: 1, 8, 128>}]} {
    %c0 = arith.constant 0 : index
    %c0_0 = arith.constant 0 : index
    %c0_1 = arith.constant 0 : index
    %0 = vector.load %arg2[%c0, %c0_0, %c0_1] : memref<1x8x128xbf16, #tpu.memory_space<vmem>>, vector<1x8x128xbf16>
    %1 = vector.shape_cast %0 : vector<1x8x128xbf16> to vector<8x128xbf16>
    %c0_2 = arith.constant 0 : index
    %c0_3 = arith.constant 0 : index
    %2 = vector.load %arg3[%c0_2, %c0_3] : memref<128x128xbf16, #tpu.memory_space<vmem>>, vector<128x128xbf16>
    %cst = arith.constant dense<0.000000e+00> : vector<8x128xf32>
    %3 = tpu.matmul %1, %2, %cst {dimension_numbers = #tpu.dot_dimension_numbers<[1], [0], [0], [1], [0, 0, 1, 1], [], []>} : vector<8x128xbf16>, vector<128x128xbf16>, vector<8x128xf32> -> vector<8x128xf32>
    %4 = arith.truncf %3 : vector<8x128xf32> to vector<8x128xbf16>
    %c0_4 = arith.constant 0 : index
    %c0_5 = arith.constant 0 : index
    %c0_6 = arith.constant 0 : index
    %5 = vector.load %arg4[%c0_4, %c0_5, %c0_6] : memref<1x8x128xbf16, #tpu.memory_space<vmem>>, vector<1x8x128xbf16>
    %6 = vector.shape_cast %5 : vector<1x8x128xbf16> to vector<8x128xbf16>
    %7 = vector.shape_cast %4 : vector<8x128xbf16> to vector<1x8x128xbf16>
    tpu.vector_store %arg4[%c0_4, %c0_5, %c0_6], %7 {strides = array<i32>} : memref<1x8x128xbf16, #tpu.memory_space<vmem>>, vector<1x8x128xbf16>,
    return
  }
  func.func @transform_0(%arg0: i32, %arg1: i32) -> (i32, i32, i32) {
    %c0_i32 = arith.constant 0 : i32
    %c0_i32_0 = arith.constant 0 : i32
    return %arg0, %arg1, %c0_i32 : i32, i32, i32
  }
  func.func @transform_1(%arg0: i32, %arg1: i32) -> (i32, i32) {
    %c0_i32 = arith.constant 0 : i32
    %c0_i32_0 = arith.constant 0 : i32
    %c0_i32_1 = arith.constant 0 : i32
    return %c0_i32, %c0_i32_0 : i32, i32
  }
  func.func @transform_2(%arg0: i32, %arg1: i32) -> (i32, i32, i32) {
    %c0_i32 = arith.constant 0 : i32
    %c0_i32_0 = arith.constant 0 : i32
    return %arg0, %arg1, %c0_i32 : i32, i32, i32
  }
}

</mosaic_0001>

<bundles_post_ra>
// kernel: tpu_custom_call.1
= control target key start
LH: loop header
LB: loop body
LE: loop exit
PB: predicated region body
PF: predicated region fallthrough
CT: control target
= control target key end

     0   :  { %7 = vsyncpa [#allocation3], 0  ;;  %s930_s0 = inlined_call_operand.hbm [shape: bf16[2,8,128], index: 0, kind: input, shape index: {}]   ;;  %s931_s1 = inlined_call_operand.hbm [shape: bf16[128,128], index: 1, kind: input, shape index: {}]   ;;  %s932_s2 = inlined_call_operand.hbm [shape: bf16[2,8,128], index: 2, kind: output, shape index: {}]  }
   0x1   :  { %9 = vsyncpa [#allocation3 + $0x1], 0 }
   0x2   :  { %10 = vsyncpa [#allocation6], 0 }
   0x3   :  { %11 = vsyncpa [#allocation4], 0 }
   0x4   :  { %13 = vsyncpa [#allocation4 + $0x1], 0  ;;  %s709_s9 = smov 0   ;;  %s711_s10 = smov 0  }
   0x5   :  { %s713_s11 = smov 0   ;;  %s715_s12 = smov 0  }
   0x6   :  { %s717_s13 = smov 0   ;;  %s719_s14 = smov 0  }
   0x7 LB: > { %s404_s15 = sadd.s32 4294967295, %s685_s14   ;;  %s405_s16 = sadd.s32 4294967294, %s685_s14   ;;  %s685_s14 = sphi %s719_s14, %s19_s14   ;;  %s681_s13 = sphi %s717_s13, %s956_s13   ;;  %s677_s12 = sphi %s715_s12, %s955_s12   ;;  %s673_s11 = sphi %s713_s11, %s954_s11   ;;  %s669_s10 = sphi %s711_s10, %s953_s10   ;;  %s665_s9 = sphi %s709_s9, %s952_s9  }
   0x8   : > { %p53_p0 = scmp.ne.s32.totalorder %s669_s10, %s665_s9  ;;  %p743_p1 = scmp.eq.s32.totalorder %s404_s15, 0 }
   0x9   : > { %p747_p2 = scmp.eq.s32.totalorder %s404_s15, 1  ;;  %p106_p3 = scmp.eq.s32.totalorder %s405_s16, 1 }
   0xa   : > { %s937_s17 = scalar_select %p743_p1, 1, 0 }
   0xb   : > { %s938_s18 = scalar_select %p747_p2, 1, 0 }
   0xc   : > { %p753_p4 = por %p743_p1, %p53_p0  ;;  %p406_p5 = scmp.ge.s32.totalorder %s685_s14, 1 }
   0xd   : > { %p758_p6 = por %p106_p3, %p53_p0  ;;  %p113_p7 = scmp.lt.s32.totalorder %s685_s14, 3 }
   0xe   : > { %s939_s19 = scalar_select %p753_p4, 1, 0 }
   0xf   : > { %s940_s20 = scalar_select %p758_p6, 1, 0 }
  0x10   : > { %p763_p8 = pnand %p406_p5, %p113_p7  ;;  %s687_s22 = smov [#allocation5]  }
  0x11   : > { %s125_s23 = sshll.u32 %s687_s22, 4  ;;  %s31_s25 = sadd.s32 1, %s681_s13  ;;  %s126_s23 = int_to_ptr.vmem [resolvable:$true] %s125_s23 }
  0x12   : > { %s941_s21 = scalar_select %p763_p8, 1, 0 }
  0x13   : > { %p464_p9 = pneg %p763_p8  ;;  %s541_s28 = scalar_lea.hbm %s931_s1, 1024 }
  0x14   : > { %p542_p12 = scmp.ne.s32.totalorder %s931_s1, %s541_s28  ;;  %p548_p5 = scmp.lt.u32.totalorder %s541_s28, %s931_s1 }
  0x15   : > { %p772_p11 = pnand %p464_p9, %p743_p1 }
  0x17   : > { %p543_p13 = pneg %p772_p11 }
  0x19   : > { %p544_p0 = pnand %p543_p13, %p542_p12 }
  0x1b   : > { %p545_p3 = pneg %p544_p0 }
  0x1d   : > { %p550_p7 = pnand %p548_p5, %p545_p3 }
  0x1f   : > { %553 = shalt.err (!%p550_p7)
}
  0x20   : > { %s554_s5 = scalar_lea.vmem %s126_s23, 1024  ;;  %p562_p1 = scmp.lt.s32.totalorder %s126_s23, %s126_s23 }
  0x21   : > { %p555_p9 = scmp.ne.s32.totalorder %s126_s23, %s554_s5  ;;  %p563_p4 = scmp.lt.s32.totalorder %s554_s5, %s554_s5 }
  0x23   : > { %p557_p10 = pnand %p555_p9, %p543_p13  ;;  %p564_p8 = por %p563_p4, %p562_p1 }
  0x25   : > { %p558_p6 = pneg %p557_p10 }
  0x27   : > { %p565_p2 = pnand %p564_p8, %p558_p6 }
  0x29   : > { %568 = shalt.err (!%p565_p2)
}
  0x2a   : > { %s688_s6 = smov 64   ;;  %s689_s7 = smov 4  }
  0x2b   : > { %467 = dma.hbm_to_vmem [thread:$0]  (!%p772_p11), %s931_s1, 1024, %s126_s23, [#allocation6], %s688_s6, %s688_s6, %s689_s7  }
  0x2c   : > { %p33_p1 = scmp.ge.s32.totalorder %s31_s25, 2  ;;  %s40_s16 = sadd.s32 1, %s673_s11 }
  0x2d   : > { %p47_p2 = scmp.ne.s32.totalorder %s673_s11, %s669_s10  ;;  %p48_p4 = scmp.eq.s32.totalorder %s685_s14, 0 }
  0x2e   : > { %s958_s25 = smov (%p33_p1, %s31_s25), 0  ;;  %p944_p8 = scmp.ne.s32.totalorder %s938_s18, 0 }
  0x2f   : > { %p799_p6 = por %p48_p4, %p47_p2  ;;  %s35_s24 = ssub.s32 %s681_s13, %s958_s25 }
  0x30   : > { %p805_p10 = por %p944_p8, %p47_p2  ;;  %p477_p12 = scmp.lt.s32.totalorder %s685_s14, 2 }
  0x31   : > { %p38_p11 = scmp.eq.s32.totalorder %s35_s24, 0  ;;  %s139_s23 = sand.u32 1, %s673_s11  }
  0x32   : > { %s409_s27 = sshll.u32 %s139_s23, 2  ;;  %s410_s29 = sshll.u32 %s681_s13, 6 }
  0x33   : > { %s814_s28 = scalar_select %p38_p11, %s673_s11, %s40_s16  }
  0x34   : > { %s820_s4 = scalar_lea.hbm %s930_s0, %s410_s29  ;;  %s143_s18 = scalar_lea.vmem [#allocation2], %s409_s27 }
  0x35   : > { %s151_s5 = sshll.u32 %s143_s18, 4  ;;  %p826_p13 = pnand %p477_p12, %p799_p6  ;;  %s822_s5 = int_to_ptr.vmem [resolvable:$true] %s151_s5 }
  0x36   : > { %s140_s7 = scalar_lea.sflag [#allocation3], %s139_s23  ;;  %s569_s8 = scalar_lea.hbm %s820_s4, 64 }
  0x37   : > { %p570_p0 = scmp.ne.s32.totalorder %s820_s4, %s569_s8  ;;  %p571_p3 = pneg %p826_p13 }
  0x38   : > { %s574_s24 = scalar_lea.hbm %s930_s0, 128  ;;  %p575_p9 = scmp.lt.u32.totalorder %s820_s4, %s930_s0 }
  0x39   : > { %p572_p5 = pnand %p571_p3, %p570_p0  ;;  %p576_p1 = scmp.lt.u32.totalorder %s574_s24, %s569_s8 }
  0x3a   : > { %p578_p4 = scmp.lt.u32.totalorder %s569_s8, %s820_s4 }
  0x3b   : > { %p573_p7 = pneg %p572_p5  ;;  %p577_p2 = por %p576_p1, %p575_p9 }
  0x3d   : > { %p579_p6 = por %p578_p4, %p577_p2 }
  0x3f   : > { %p580_p8 = pnand %p579_p6, %p573_p7 }
  0x41   : > { %583 = shalt.err (!%p580_p8)
}
  0x42   : > { %s584_s23 = scalar_lea.vmem %s822_s5, 64  ;;  %s690_s29 = smov [#allocation2]  }
  0x43   : > { %p585_p12 = scmp.ne.s32.totalorder %s822_s5, %s584_s23  ;;  %s589_s30 = sshll.u32 %s690_s29, 4  ;;  %s590_s30 = int_to_ptr.vmem [resolvable:$false] %s589_s30 }
  0x44   : > { %s591_s3 = scalar_lea.vmem %s590_s30, 128  ;;  %p592_p5 = scmp.lt.s32.totalorder %s822_s5, %s590_s30 }
  0x45   : > { %p587_p11 = pnand %p585_p12, %p571_p3  ;;  %p593_p9 = scmp.lt.s32.totalorder %s591_s3, %s584_s23 }
  0x47   : > { %p588_p0 = pneg %p587_p11  ;;  %p594_p1 = por %p593_p9, %p592_p5 }
  0x49   : > { %p595_p2 = pnand %p594_p1, %p588_p0 }
  0x4b   : > { %598 = shalt.err (!%p595_p2)
}
  0x4c   : > { %471 = dma.hbm_to_vmem [thread:$0]  (!%p826_p13), %s820_s4, 64, %s822_s5, %s140_s7  }
  0x4d   : > { %p947_p7 = scmp.ne.s32.totalorder %s941_s21, 0 }
  0x4e   : > { %s858_s18 = sand.u32 (!%p947_p7), 1, %s669_s10   ;;  %p948_p3 = scmp.ne.s32.totalorder (!%p947_p7), %s939_s19, 0 }
  0x4f   : > { %160 = sbr.rel (%p947_p7) target bundleno = 351 (0x15f), region = 28  ;;  %s412_s8 = sshll.u32 (!%p947_p7), %s858_s18, 2 }
  0x50   : > { %s163_s15 = scalar_lea.sflag (!%p947_p7), [#allocation3], %s858_s18  ;;  %s864_s16 = scalar_lea.vmem (!%p947_p7), [#allocation2], %s412_s8 }
  0x56   : > { %652 = dma.done.wait (%p948_p3), %s163_s15, 64  }
  0x57   : > { %654 = vsyncadd (%p948_p3), %s163_s15, 4294967232  ;;  %p949_p13 = scmp.ne.s32.totalorder %s937_s17, 0 }
  0x59   : > { %656 = dma.done.wait (%p949_p13), [#allocation6], 1024  }
  0x5a   : > { %658 = vsyncadd (%p949_p13), [#allocation6], 4294966272  ;;  %v691_v0 = vmov 0.0   ;;  %vm692_vm0 = vmmov 0   ;;  %v533_v1 = vld [vmem:[#allocation5] sm:$0xff]   ;;  %v534_v2 = vld [vmem:[#allocation5 + $0x8] sm:$0xff]  }
  0x5b   : > { %436 = vmatprep.subr.bf16.mxu0 %v691_v0  ;;  %452 = vmatprep.mubr.msk.bf16.mxu0 %vm692_vm0, %v691_v0  ;;  %v535_v3 = vld [vmem:[#allocation5 + $0x10] sm:$0xff]   ;;  %v536_v4 = vld [vmem:[#allocation5 + $0x18] sm:$0xff]   ;;  %v537_v5 = vld [vmem:[#allocation5 + $0x20] sm:$0xff]   ;;  %s424_s17 = sshll.u32 %s677_s12, 6  ;;  %s190_s19 = scalar_lea.vmem [#allocation7], %s412_s8 }
  0x5c   : > { %437 = vmatpush3.bf16.msra.mxu0 %v533_v1  ;;  %v538_v6 = vld [vmem:[#allocation5 + $0x28] sm:$0xff]   ;;  %v539_v7 = vld [vmem:[#allocation5 + $0x30] sm:$0xff]   ;;  %v540_v8 = vld [vmem:[#allocation5 + $0x38] sm:$0xff]   ;;  %s314_s21 = sshll.u32 %s190_s19, 4  ;;  %s881_s6 = scalar_lea.hbm %s932_s2, %s424_s17  ;;  %s883_s21 = int_to_ptr.vmem [resolvable:$true] %s314_s21 }
  0x5d   : > { %438 = vmatprep.subr.bf16.mxu0 %v691_v0  ;;  %v192_v9 = vld [vmem:[%s864_s16] sm:$0xf]  ;;  %s300_s12 = scalar_lea.sflag [#allocation4], %s858_s18  ;;  %s599_s7 = scalar_lea.vmem %s883_s21, 64 }
  0x5e   : > { %p600_p4 = scmp.ne.s32.totalorder %s883_s21, %s599_s7  ;;  %s693_s24 = smov [#allocation7]  }
  0x5f   : > { %s603_s22 = sshll.u32 %s693_s24, 4  ;;  %s604_s22 = int_to_ptr.vmem [resolvable:$false] %s603_s22 }
  0x60   : > { %439 = vmatpush3.bf16.msra.mxu0 %v534_v2  ;;  %p601_p6 = pnand %p600_p4, %p805_p10  ;;  %s605_s27 = scalar_lea.vmem %s604_s22, 128 }
  0x61   : > { %440 = vmatprep.subr.bf16.mxu0 %v691_v0  ;;  %p606_p12 = scmp.lt.s32.totalorder %s883_s21, %s604_s22  ;;  %p607_p11 = scmp.lt.s32.totalorder %s605_s27, %s599_s7 }
  0x62   : > { %p602_p8 = pneg %p601_p6 }
  0x63   : > { %p608_p0 = por %p607_p11, %p606_p12 }
  0x64   : > { %441 = vmatpush3.bf16.msra.mxu0 %v535_v3 }
  0x65   : > { %442 = vmatprep.subr.bf16.mxu0 %v691_v0  ;;  %p609_p5 = pnand %p608_p0, %p602_p8 }
  0x68   : > { %443 = vmatpush3.bf16.msra.mxu0 %v536_v4 }
  0x69   : > { %444 = vmatprep.subr.bf16.mxu0 %v691_v0 }
  0x6c   : > { %445 = vmatpush3.bf16.msra.mxu0 %v537_v5 }
  0x6d   : > { %446 = vmatprep.subr.bf16.mxu0 %v691_v0 }
  0x70   : > { %447 = vmatpush3.bf16.msra.mxu0 %v538_v6 }
  0x71   : > { %448 = vmatprep.subr.bf16.mxu0 %v691_v0 }
  0x74   : > { %449 = vmatpush3.bf16.msra.mxu0 %v539_v7 }
  0x75   : > { %450 = vmatprep.subr.bf16.mxu0 %v691_v0 }
  0x78   : > { %451 = vmatpush3.bf16.msra.mxu0 %v540_v8 }
  0x7b   : > { %453 = vmatmul.mubr.bf16.vlgmr.msra.gmra.mrb[0].mxu0 %v192_v9 }
 0x14e   : > { %v291_v10 = vpop.f32.mrb[0].mxu0 }
 0x14f   : > { %v297_v11 = vpack.c.bf16 %v291_v10, %v291_v10  ;;  %v454_v12 = vpop.f32.mrb[1].mxu0 }
 0x150   : > { %v294_v13 = vpop.f32.mrb[2].mxu0 }
 0x151   : > { %298 = vst [vmem:[%s190_s19] sm:$0xf] %v297_v11  ;;  %v455_v14 = vpop.f32.mrb[3].mxu0 }
 0x152   : > { %612 = shalt.err (!%p609_p5)
}
 0x153   : > { %s613_s23 = scalar_lea.hbm %s881_s6, 64  ;;  %s617_s3 = scalar_lea.hbm %s932_s2, 128 }
 0x154   : > { %p614_p9 = scmp.ne.s32.totalorder %s881_s6, %s613_s23  ;;  %p618_p7 = scmp.lt.u32.totalorder %s881_s6, %s932_s2 }
 0x155   : > { %p619_p3 = scmp.lt.u32.totalorder %s617_s3, %s613_s23  ;;  %p621_p4 = scmp.lt.u32.totalorder %s613_s23, %s881_s6 }
 0x156   : > { %p615_p1 = pnand %p614_p9, %p805_p10 }
 0x157   : > { %p620_p13 = por %p619_p3, %p618_p7 }
 0x158   : > { %p616_p2 = pneg %p615_p1 }
 0x159   : > { %p622_p6 = por %p621_p4, %p620_p13 }
 0x15b   : > { %p623_p8 = pnand %p622_p6, %p616_p2 }
 0x15d   : > { %626 = shalt.err (!%p623_p8)
}
 0x15e   : > { %462 = dma.vmem_to_hbm [thread:$0]  (%p805_p10), %s883_s21, 64, %s881_s6, %s300_s12  }
 0x15f PF: > { %s326_s15 = sand.u32 1, %s665_s9   ;;  %p950_p12 = scmp.ne.s32.totalorder %s940_s20, 0 }
 0x160   : > { %p951_p11 = scmp.ge.s32.totalorder %s685_s14, 2  ;;  %s327_s16 = scalar_lea.sflag [#allocation4], %s326_s15 }
 0x162   : > { %p473_p0 = pnand %p951_p11, %p950_p12 }
 0x164   : > { %660 = dma.done.wait (!%p473_p0), %s327_s16, 64  }
 0x165   : > { %662 = vsyncadd (!%p473_p0), %s327_s16, 4294967232  ;;  %s19_s14 = sadd.s32 1, %s685_s14   ;;  %s952_s9 = smov %s669_s10 }
 0x166   : > { %p16_p5 = scmp.ge.s32.totalorder %s19_s14, 4   ;;  %s953_s10 = smov %s673_s11 }
 0x167   : > { %s954_s11 = smov %s814_s28  ;;  %s955_s12 = smov %s681_s13 }
 0x168   : > { %s956_s13 = smov %s958_s25  ;;  %18 = sbr.rel (!%p16_p5) target bundleno = 7 (0x7), region = 77 }
 0x16f   :  { %332 = vsyncpa [#allocation3], 1 }
 0x170   :  { %334 = vsyncpa [#allocation3 + $0x1], 1 }
 0x171   :  { %335 = vsyncpa [#allocation6], 1 }
 0x172   :  { %336 = vsyncpa [#allocation4], 1 }
 0x173   :  { %338 = vsyncpa [#allocation4 + $0x1], 1 }

</bundles_post_ra>
